<compile_context>
chip_gen: v5e
topology: v5e:2x2
jax: 0.10.0
libtpu: 0.0.40
codegen_flags: <defaults>
</compile_context>

<pallas_src>
import numpy as np
import jax
import jax.numpy as jnp
from jax import lax
from jax.experimental import pallas as pl
from jax.experimental.pallas import tpu as pltpu

TILE_PTS_LIN = 4096   # max point rows per block in the fused linear kernel
TILE_P = 512          # point rows per tile in the segment-mean kernel
TILE_V = 128          # voxel rows per resident output block in the segment-mean kernel


def _round_up(x, m):
    return (x + m - 1) // m * m


# ---------------------------------------------------------------------------
# Kernel 1: fused Linear (no bias) + folded BatchNorm + ReLU over point tiles.
# The input arrives as several channel "chunks" (e.g. [h, mean[inv]] or
# [raw_feats, f_cluster, f_center]); the concat is fused by splitting the weight
# rows, so the concatenated tensor is never materialized in HBM.  Operands are
# bf16, MXU accumulation is f32, the store is bf16 (halves write traffic).
# TODO(synk): a lane-dense (N/8, 8*cout) output repack could further improve the
#             <=32-wide masked stores; bf16 store is the low-risk half of that win.
# ---------------------------------------------------------------------------
def _make_linear_kernel(num_chunks):
    def kernel(*refs):
        x_refs = refs[:num_chunks]
        w_refs = refs[num_chunks:2 * num_chunks]
        scale_ref, shift_ref, o_ref = refs[2 * num_chunks:]
        h = jnp.dot(x_refs[0][...], w_refs[0][...],
                    preferred_element_type=jnp.float32)
        for xr, wr in zip(x_refs[1:], w_refs[1:]):
            h = h + jnp.dot(xr[...], wr[...], preferred_element_type=jnp.float32)
        h = h * scale_ref[...] + shift_ref[...]
        o_ref[...] = jnp.maximum(h, 0.0).astype(o_ref.dtype)
    return kernel


def linear_bn_relu(chunks, w, scale, shift, out_dtype=jnp.bfloat16):
    """relu(bn(concat(chunks, -1) @ w)) without materializing the concat."""
    n = chunks[0].shape[0]                       # already padded to a TILE_P multiple
    cout = int(w.shape[1])
    widths = [int(c.shape[1]) for c in chunks]
    offs = np.concatenate([[0], np.cumsum(widths)]).astype(np.int64)
    w_chunks = [w[int(offs[i]):int(offs[i + 1]), :].astype(jnp.bfloat16)
                for i in range(len(chunks))]

    # Big tiles (memory-bound kernel), but keep >=2 blocks on the parallel axis when
    # the cloud is large enough so v7x's second TensorCore is not idle.
    if n >= 2 * TILE_P:
        tile = min(TILE_PTS_LIN, _round_up(n // 2, TILE_P))
    else:
        tile = n

    in_specs = (
        [pl.BlockSpec((tile, widths[i]), lambda t: (t, 0)) for i in range(len(chunks))]
        + [pl.BlockSpec((widths[i], cout), lambda t: (0, 0)) for i in range(len(chunks))]
        + [pl.BlockSpec((1, cout), lambda t: (0, 0)),
           pl.BlockSpec((1, cout), lambda t: (0, 0))]
    )
    return pl.pallas_call(
        _make_linear_kernel(len(chunks)),
        out_shape=jax.ShapeDtypeStruct((n, cout), out_dtype),
        grid=(pl.cdiv(n, tile),),
        in_specs=in_specs,
        out_specs=pl.BlockSpec((tile, cout), lambda t: (t, 0)),
        compiler_params=pltpu.CompilerParams(dimension_semantics=("parallel",)),
    )(*chunks, *w_chunks, scale, shift)


# ---------------------------------------------------------------------------
# Kernel 2: banded segment (scatter) mean.
# Points are sorted by voxel id and padded with a sentinel id, so each voxel block
# [vb*TILE_V, (vb+1)*TILE_V) only touches a contiguous range of point tiles whose
# start / count are scalar-prefetched.  Each live step builds a [TILE_V, TILE_P]
# one-hot band (the sentinel never matches -> no extra masking) and does one MXU
# matmul into an f32 VMEM accumulator.  Per-voxel 1/count is precomputed on the
# host, so finalize is a single broadcast multiply and bf16 store.
# ---------------------------------------------------------------------------
def _make_segment_kernel(tile_v, tile_p, operand_dtype):
    def kernel(tstart_ref, ntiles_ref, inv_ref, x_ref, invcnt_ref, out_ref, acc_ref):
        vb = pl.program_id(0)
        j = pl.program_id(1)

        @pl.when(j == 0)
        def _init():
            acc_ref[...] = jnp.zeros_like(acc_ref)

        @pl.when(j < ntiles_ref[vb])
        def _accumulate():
            local = inv_ref[...] - vb * tile_v                        # [1, tile_p]
            vids = lax.broadcasted_iota(jnp.int32, (tile_v, tile_p), 0)
            onehot = (vids == local).astype(operand_dtype)            # [tile_v, tile_p]
            acc_ref[...] += jnp.dot(onehot, x_ref[...],
                                    preferred_element_type=jnp.float32)

        @pl.when(j == pl.num_programs(1) - 1)
        def _finalize():
            out_ref[...] = (acc_ref[...] * invcnt_ref[...]).astype(out_ref.dtype)

    return kernel


def make_segment_meta(inv_sorted_padded, n_pad, num_voxels):
    """Host-side banding metadata + per-voxel 1/count (exact integer counts)."""
    num_blocks = max(1, -(-num_voxels // TILE_V))
    num_tiles = n_pad // TILE_P
    block_lo = np.arange(num_blocks, dtype=np.int64) * TILE_V
    block_hi = block_lo + TILE_V
    pstart = np.searchsorted(inv_sorted_padded, block_lo, side="left")
    pend = np.searchsorted(inv_sorted_padded, block_hi, side="left")
    tstart = np.minimum(pstart // TILE_P, num_tiles - 1).astype(np.int64)
    tend = np.maximum(np.minimum(-(-pend // TILE_P), num_tiles), tstart + 1)
    ntiles = (tend - tstart).astype(np.int32)            # always >= 1
    # Bucket the inner grid extent to a power of two -> fewer distinct grid shapes
    # across frames -> pallas_call compile-cache hits.
    max_tiles = 1 << (int(ntiles.max()) - 1).bit_length()
    cnt = np.bincount(
        inv_sorted_padded[inv_sorted_padded < num_voxels].astype(np.int64),
        minlength=num_blocks * TILE_V).astype(np.float32)
    inv_cnt = (1.0 / np.maximum(cnt, 1.0)).reshape(-1, 1)
    return dict(
        num_blocks=int(num_blocks),
        num_tiles=int(num_tiles),
        max_tiles=int(max_tiles),
        tstart=jnp.asarray(tstart.astype(np.int32)),
        ntiles=jnp.asarray(ntiles),
        inv_cnt=jnp.asarray(inv_cnt),
        num_segments=int(num_voxels),
    )


def segment_mean(x, inv2d, meta, out_dtype=jnp.bfloat16):
    """Per-voxel mean of x ([n_pad, d], sorted+padded by voxel id) -> [nb*TILE_V, d]."""
    n, d = x.shape
    nb, mt = meta["num_blocks"], meta["max_tiles"]
    kernel = _make_segment_kernel(TILE_V, TILE_P, x.dtype)

    return pl.pallas_call(
        kernel,
        out_shape=jax.ShapeDtypeStruct((nb * TILE_V, d), out_dtype),
        grid_spec=pltpu.PrefetchScalarGridSpec(
            num_scalar_prefetch=2,
            grid=(nb, mt),
            in_specs=[
                # Predicated-off steps (j >= ntiles[vb]) repeat the last valid tile
                # index, so no extra HBM traffic is generated for skipped steps.
                pl.BlockSpec(
                    (1, TILE_P),
                    lambda vb, j, ts, ntl:
                        (0, ts[vb] + jnp.minimum(j, jnp.maximum(ntl[vb] - 1, 0)))),
                pl.BlockSpec(
                    (TILE_P, d),
                    lambda vb, j, ts, ntl:
                        (ts[vb] + jnp.minimum(j, jnp.maximum(ntl[vb] - 1, 0)), 0)),
                pl.BlockSpec((TILE_V, 1), lambda vb, j, ts, ntl: (vb, 0)),
            ],
            out_specs=pl.BlockSpec((TILE_V, d), lambda vb, j, ts, ntl: (vb, 0)),
            scratch_shapes=[pltpu.VMEM((TILE_V, d), jnp.float32)],
        ),
        compiler_params=pltpu.CompilerParams(
            # voxel-block axis is parallel (disjoint outputs) -> v7x megacore win.
            dimension_semantics=("parallel", "arbitrary"),
            vmem_limit_bytes=32 * 1024 * 1024,
        ),
    )(meta["tstart"], meta["ntiles"], inv2d, x, meta["inv_cnt"])


# ---------------------------------------------------------------------------
# PFNLayerV2 + DynamicPillarVFE forward (glue in JAX/numpy, hot path in Pallas)
# ---------------------------------------------------------------------------
def dynamic_pillar_vfe_forward(points, pfn_params, voxel_size, grid_size, pc_range):
    points_np = np.asarray(points, dtype=np.float64)
    voxel_x, voxel_y = float(voxel_size[0]), float(voxel_size[1])
    x_offset = voxel_x / 2.0 + float(pc_range[0])
    y_offset = voxel_y / 2.0 + float(pc_range[1])
    scale_xy = int(grid_size[0] * grid_size[1])
    scale_y = int(grid_size[1])
    n = points_np.shape[0]

    # --- host-side voxelization (matches torch.unique on merged coords) ------
    pts_coords = np.floor(
        (points_np[:, [1, 2]] - pc_range[[0, 1]]) / voxel_size[[0, 1]]
    ).astype(np.int64)
    merge = (points_np[:, 0].astype(np.int64) * scale_xy
             + pts_coords[:, 0] * scale_y + pts_coords[:, 1])
    unq_coords, unq_inv = np.unique(merge, return_inverse=True)
    num_voxels = int(unq_coords.shape[0])

    # --- sort points by voxel id and pad to a TILE_P multiple (sentinel id) --
    order = np.argsort(unq_inv, kind="stable")
    n_pad = max(TILE_P, _round_up(n, TILE_P))
    num_blocks = max(1, -(-num_voxels // TILE_V))
    sentinel = num_blocks * TILE_V                 # never matches any voxel-block row

    inv_sorted_np = np.full((n_pad,), sentinel, np.int32)
    inv_sorted_np[:n] = unq_inv[order].astype(np.int32)
    pts_np = np.zeros((n_pad, points_np.shape[1]), np.float32)
    pts_np[:n] = points_np[order].astype(np.float32)
    crd_np = np.zeros((n_pad, 2), np.float32)
    crd_np[:n] = pts_coords[order].astype(np.float32)
    # in-bounds gather indices for mean[inv] (padded rows read row 0 harmlessly)
    gather_np = np.where(np.arange(n_pad) < n, inv_sorted_np, 0).astype(np.int32)

    meta = make_segment_meta(inv_sorted_np, n_pad, num_voxels)
    inv2d = jnp.asarray(inv_sorted_np.reshape(1, n_pad))
    inv_gather = jnp.asarray(gather_np)
    pts = jnp.asarray(pts_np)
    coords = jnp.asarray(crd_np)

    points_xyz = pts[:, 1:4]
    # per-pillar xyz mean kept in f32 (3-channel table is tiny; preserves f_cluster
    # accuracy for large point-cloud ranges)
    points_mean = segment_mean(points_xyz, inv2d, meta, out_dtype=jnp.float32)
    f_cluster = points_xyz - jnp.take(points_mean, inv_gather, axis=0)
    f_center = jnp.stack(
        [
            points_xyz[:, 0] - (coords[:, 0] * voxel_x + x_offset),
            points_xyz[:, 1] - (coords[:, 1] * voxel_y + y_offset),
            jnp.zeros((n_pad,), jnp.float32),
        ],
        axis=1,
    )

    bf16 = jnp.bfloat16
    chunks = [pts[:, 1:].astype(bf16), f_cluster.astype(bf16), f_center.astype(bf16)]
    n_layers = len(pfn_params)
    features = None
    for li, p in enumerate(pfn_params):
        last = li == n_layers - 1
        h = linear_bn_relu(chunks, p["w"], p["scale"], p["shift"])          # bf16
        x_mean = segment_mean(h, inv2d, meta,
                              out_dtype=jnp.float32 if last else bf16)
        if last:
            features = x_mean[:num_voxels]
        else:
            # TODO(synk): fuse this gather into the next linear kernel via
            # scalar-prefetched contiguous voxel-row slices per point tile.
            chunks = [h, jnp.take(x_mean, inv_gather, axis=0)]

    voxel_coords = np.stack(
        [
            unq_coords // scale_xy,
            unq_coords % scale_xy // scale_y,
            unq_coords % scale_y,
            np.zeros_like(unq_coords),
        ],
        axis=1,
    )[:, [0, 3, 2, 1]]
    return features, jnp.asarray(voxel_coords.astype(np.int32)), unq_inv


# ---------------------------------------------------------------------------
# Deterministic parameter init (Linear no-bias + folded BatchNorm1d, eps=1e-3)
# ---------------------------------------------------------------------------
def init_pfn_params(key, in_ch, out_ch, eps=1e-3):
    k1, k2, k3, k4, k5 = jax.random.split(key, 5)
    w = jax.random.normal(k1, (in_ch, out_ch), jnp.float32) * 0.1
    gamma = jax.random.uniform(k2, (out_ch,), jnp.float32, minval=0.8, maxval=1.2)
    beta = jax.random.normal(k3, (out_ch,), jnp.float32) * 0.1
    rmean = jax.random.normal(k4, (out_ch,), jnp.float32) * 0.1
    rvar = jax.random.uniform(k5, (out_ch,), jnp.float32, minval=0.7, maxval=1.3)
    scale = gamma / jnp.sqrt(rvar + eps)
    shift = beta - rmean * scale
    return {"w": w, "scale": scale.reshape(1, -1), "shift": shift.reshape(1, -1)}


# ---------------------------------------------------------------------------
# References:
#   _jax_ref_forward: pure-JAX, same bf16/f32 dtype strategy (tight kernel check)
#   _np_forward:      float64 module semantics (loose check; bf16 intermediates)
# ---------------------------------------------------------------------------
def _jax_ref_forward(points, pfn_params, voxel_size, grid_size, pc_range):
    points_np = np.asarray(points, np.float64)
    voxel_x, voxel_y = float(voxel_size[0]), float(voxel_size[1])
    x_off = voxel_x / 2.0 + float(pc_range[0])
    y_off = voxel_y / 2.0 + float(pc_range[1])
    scale_xy = int(grid_size[0] * grid_size[1])
    scale_y = int(grid_size[1])
    coords_np = np.floor(
        (points_np[:, [1, 2]] - pc_range[[0, 1]]) / voxel_size[[0, 1]]).astype(np.int64)
    merge = (points_np[:, 0].astype(np.int64) * scale_xy
             + coords_np[:, 0] * scale_y + coords_np[:, 1])
    _, unq_inv = np.unique(merge, return_inverse=True)
    v = int(unq_inv.max()) + 1
    cnt = np.bincount(unq_inv, minlength=v).astype(np.float32)
    inv_cnt = jnp.asarray((1.0 / np.maximum(cnt, 1.0)).reshape(-1, 1))
    inv = jnp.asarray(unq_inv.astype(np.int32))

    def seg_mean(x):
        s = jax.ops.segment_sum(x.astype(jnp.float32), inv, num_segments=v)
        return s * inv_cnt

    pts = jnp.asarray(points_np.astype(np.float32))
    xyz = pts[:, 1:4]
    crd = jnp.asarray(coords_np.astype(np.float32))
    mean = seg_mean(xyz)
    f_cluster = xyz - mean[inv]
    f_center = jnp.stack(
        [xyz[:, 0] - (crd[:, 0] * voxel_x + x_off),
         xyz[:, 1] - (crd[:, 1] * voxel_y + y_off),
         jnp.zeros((pts.shape[0],), jnp.float32)], axis=1)
    feats = jnp.concatenate([pts[:, 1:], f_cluster, f_center], axis=1).astype(jnp.bfloat16)
    for li, p in enumerate(pfn_params):
        w = p["w"].astype(jnp.bfloat16)
        h = jnp.dot(feats, w, preferred_element_type=jnp.float32)
        h = h * p["scale"] + p["shift"]
        h = jnp.maximum(h, 0.0).astype(jnp.bfloat16)
        m = seg_mean(h)
        if li == len(pfn_params) - 1:
            return m
        feats = jnp.concatenate([h, m[inv].astype(jnp.bfloat16)], axis=1)


def _np_segment_mean(x, inv, v):
    s = np.zeros((v, x.shape[1]), np.float64)
    np.add.at(s, inv, x)
    c = np.zeros((v,), np.float64)
    np.add.at(c, inv, 1.0)
    c = np.maximum(c, 1.0)
    return s / c[:, None]


def _np_forward(points, pfn_params, voxel_size, grid_size, pc_range):
    points = np.asarray(points, np.float64)
    voxel_x, voxel_y = float(voxel_size[0]), float(voxel_size[1])
    x_off = voxel_x / 2 + float(pc_range[0])
    y_off = voxel_y / 2 + float(pc_range[1])
    scale_xy = int(grid_size[0] * grid_size[1])
    scale_y = int(grid_size[1])
    coords = np.floor((points[:, [1, 2]] - pc_range[[0, 1]]) / voxel_size[[0, 1]]).astype(np.int64)
    merge = points[:, 0].astype(np.int64) * scale_xy + coords[:, 0] * scale_y + coords[:, 1]
    unq, inv = np.unique(merge, return_inverse=True)
    v = unq.shape[0]
    xyz = points[:, 1:4]
    mean = _np_segment_mean(xyz, inv, v)
    f_cluster = xyz - mean[inv]
    f_center = np.zeros_like(xyz)
    f_center[:, 0] = xyz[:, 0] - (coords[:, 0] * voxel_x + x_off)
    f_center[:, 1] = xyz[:, 1] - (coords[:, 1] * voxel_y + y_off)
    feats = np.concatenate([points[:, 1:], f_cluster, f_center], axis=1)
    n_layers = len(pfn_params)
    for li, p in enumerate(pfn_params):
        h = feats @ np.asarray(p["w"], np.float64)
        h = h * np.asarray(p["scale"], np.float64) + np.asarray(p["shift"], np.float64)
        h = np.maximum(h, 0.0)
        m = _np_segment_mean(h, inv, v)
        feats = m if li == n_layers - 1 else np.concatenate([h, m[inv]], axis=1)
    return feats


if __name__ == "__main__":
    # Config consistent with the module: original point features = 4 (x,y,z,intensity),
    # USE_ABSLOTE_XYZ=True, WITH_DISTANCE=False -> net input channels = 4 + 6 = 10,
    # NUM_FILTERS = [32, 32] -> layer0: 10 -> 16 (+concat -> 32), layer1: 32 -> 32 (last).
    N = 300
    voxel_size = np.array([0.5, 0.5, 4.0], np.float64)
    pc_range = np.array([-4.0, -4.0, -2.0, 4.0, 4.0, 2.0], np.float64)
    grid_size = np.array([16, 16, 1], np.int64)
    num_filters = [32, 32]
    in_feat = 4 + 6

    key = jax.random.PRNGKey(0)
    kb, kx, ki, kp = jax.random.split(key, 4)
    batch_idx = jax.random.randint(kb, (N,), 0, 2).astype(jnp.float32)
    xyz = jax.random.uniform(
        kx, (N, 3), jnp.float32,
        minval=jnp.array([-3.99, -3.99, -1.9], jnp.float32),
        maxval=jnp.array([3.99, 3.99, 1.9], jnp.float32),
    )
    intensity = jax.random.uniform(ki, (N, 1), jnp.float32)
    points = jnp.concatenate([batch_idx[:, None], xyz, intensity], axis=1)  # [N, 5]

    dims = [in_feat] + list(num_filters)
    pfn_params = []
    keys = jax.random.split(kp, len(dims) - 1)
    for i in range(len(dims) - 1):
        last = i >= len(dims) - 2
        out_ch = dims[i + 1] if last else dims[i + 1] // 2
        pfn_params.append(init_pfn_params(keys[i], dims[i], out_ch))

    feats, voxel_coords, unq_inv = dynamic_pillar_vfe_forward(
        points, pfn_params, voxel_size, grid_size, pc_range)
    feats = jax.block_until_ready(feats)

    # 1) Kernel fidelity: compare against a pure-JAX reference using the exact same
    #    dtype strategy (bf16 operands / stores, f32 accumulation).
    ref_same = np.asarray(_jax_ref_forward(points, pfn_params, voxel_size,
                                           grid_size, pc_range), np.float32)
    assert feats.shape == ref_same.shape, (feats.shape, ref_same.shape)
    np.testing.assert_allclose(np.asarray(feats, np.float32), ref_same,
                               rtol=2e-2, atol=2e-2)

    # 2) Module semantics: compare against float64 numpy (loose tolerance because the
    #    kernels intentionally keep inter-kernel tensors in bf16).
    ref64 = _np_forward(np.asarray(points), pfn_params, voxel_size, grid_size, pc_range)
    assert feats.shape == ref64.shape, (feats.shape, ref64.shape)
    assert voxel_coords.shape == (ref64.shape[0], 4)
    np.testing.assert_allclose(np.asarray(feats, np.float32), ref64,
                               rtol=1e-1, atol=1e-1)

    print("KERNEL_OK")
</pallas_src>

<mosaic_0001>
module attributes {stable_mosaic.version = 11 : i64} {
  func.func @kernel(%arg0: i32, %arg1: i32, %arg2: memref<2xi32, #tpu.memory_space<smem>>, %arg3: memref<2xi32, #tpu.memory_space<smem>>, %arg4: memref<1x512xi32, #tpu.memory_space<vmem>>, %arg5: memref<512x3xf32, #tpu.memory_space<vmem>>, %arg6: memref<128x1xf32, #tpu.memory_space<vmem>>, %arg7: memref<128x3xf32, #tpu.memory_space<vmem>>, %arg8: memref<128x3xf32, #tpu.memory_space<vmem>>) attributes {dimension_semantics = [#tpu.dimension_semantics<parallel>, #tpu.dimension_semantics<arbitrary>], iteration_bounds = array<i64: 2, 1>, scalar_prefetch = 2 : i64, scratch_operands = 1 : i64, tpu.core_type = #tpu.core_type<tc>, window_params = [{transform_indices = @transform_0, window_bounds = array<i64: 1, 512>}, {transform_indices = @transform_1, window_bounds = array<i64: 512, 3>}, {transform_indices = @transform_2, window_bounds = array<i64: 128, 1>}, {transform_indices = @transform_3, window_bounds = array<i64: 128, 3>}]} {
    %c0_i32 = arith.constant 0 : i32
    %0 = arith.cmpi eq, %arg1, %c0_i32 : i32
    %1 = arith.extui %0 : i1 to i32
    %c0_i32_0 = arith.constant 0 : i32
    %2 = arith.cmpi ne, %1, %c0_i32_0 : i32
    scf.if %2 {
      %cst = arith.constant 0.000000e+00 : f32
      %11 = vector.broadcast %cst : f32 to vector<128x3xf32>
      %c0 = arith.constant 0 : index
      %c0_4 = arith.constant 0 : index
      %12 = vector.load %arg8[%c0, %c0_4] : memref<128x3xf32, #tpu.memory_space<vmem>>, vector<128x3xf32>
      tpu.vector_store %arg8[%c0, %c0_4], %11 {strides = array<i32>} : memref<128x3xf32, #tpu.memory_space<vmem>>, vector<128x3xf32>,
    } else {
    }
    %3 = arith.index_cast %arg0 : i32 to index
    %4 = memref.load %arg3[%3] : memref<2xi32, #tpu.memory_space<smem>>
    %5 = arith.cmpi slt, %arg1, %4 : i32
    %6 = arith.extui %5 : i1 to i32
    %c0_i32_1 = arith.constant 0 : i32
    %7 = arith.cmpi ne, %6, %c0_i32_1 : i32
    scf.if %7 {
      %c0 = arith.constant 0 : index
      %c0_4 = arith.constant 0 : index
      %11 = vector.load %arg4[%c0, %c0_4] : memref<1x512xi32, #tpu.memory_space<vmem>>, vector<1x512xi32>
      %c128_i32 = arith.constant 128 : i32
      %12 = arith.muli %arg0, %c128_i32 : i32
      %13 = vector.broadcast %12 : i32 to vector<1x512xi32>
      %14 = arith.subi %11, %13 : vector<1x512xi32>
      %15 = tpu.iota {dimensions = array<i32: 0>} : vector<128x512xi32>
      %16 = vector.broadcast %14 : vector<1x512xi32> to vector<128x512xi32>
      %17 = arith.cmpi eq, %15, %16 : vector<128x512xi32>
      %18 = arith.extui %17 : vector<128x512xi1> to vector<128x512xi32>
      %19 = arith.sitofp %18 : vector<128x512xi32> to vector<128x512xf32>
      %c0_5 = arith.constant 0 : index
      %c0_6 = arith.constant 0 : index
      %20 = vector.load %arg8[%c0_5, %c0_6] : memref<128x3xf32, #tpu.memory_space<vmem>>, vector<128x3xf32>
      %c0_7 = arith.constant 0 : index
      %c0_8 = arith.constant 0 : index
      %21 = vector.load %arg5[%c0_7, %c0_8] : memref<512x3xf32, #tpu.memory_space<vmem>>, vector<512x3xf32>
      %cst = arith.constant dense<0.000000e+00> : vector<128x3xf32>
      %22 = tpu.matmul %19, %21, %cst {dimension_numbers = #tpu.dot_dimension_numbers<[1], [0], [0], [1], [0, 0, 1, 1], [], []>} : vector<128x512xf32>, vector<512x3xf32>, vector<128x3xf32> -> vector<128x3xf32>
      %23 = arith.addf %20, %22 : vector<128x3xf32>
      %c0_9 = arith.constant 0 : index
      %c0_10 = arith.constant 0 : index
      %24 = vector.load %arg8[%c0_9, %c0_10] : memref<128x3xf32, #tpu.memory_space<vmem>>, vector<128x3xf32>
      tpu.vector_store %arg8[%c0_9, %c0_10], %23 {strides = array<i32>} : memref<128x3xf32, #tpu.memory_space<vmem>>, vector<128x3xf32>,
    } else {
    }
    %c0_i32_2 = arith.constant 0 : i32
    %8 = arith.cmpi eq, %arg1, %c0_i32_2 : i32
    %9 = arith.extui %8 : i1 to i32
    %c0_i32_3 = arith.constant 0 : i32
    %10 = arith.cmpi ne, %9, %c0_i32_3 : i32
    scf.if %10 {
      %c0 = arith.constant 0 : index
      %c0_4 = arith.constant 0 : index
      %11 = vector.load %arg8[%c0, %c0_4] : memref<128x3xf32, #tpu.memory_space<vmem>>, vector<128x3xf32>
      %c0_5 = arith.constant 0 : index
      %c0_6 = arith.constant 0 : index
      %12 = vector.load %arg6[%c0_5, %c0_6] : memref<128x1xf32, #tpu.memory_space<vmem>>, vector<128x1xf32>
      %13 = vector.broadcast %12 : vector<128x1xf32> to vector<128x3xf32>
      %14 = arith.mulf %11, %13 : vector<128x3xf32>
      %c0_7 = arith.constant 0 : index
      %c0_8 = arith.constant 0 : index
      %15 = vector.load %arg7[%c0_7, %c0_8] : memref<128x3xf32, #tpu.memory_space<vmem>>, vector<128x3xf32>
      tpu.vector_store %arg7[%c0_7, %c0_8], %14 {strides = array<i32>} : memref<128x3xf32, #tpu.memory_space<vmem>>, vector<128x3xf32>,
    } else {
    }
    return
  }
  func.func @transform_0(%arg0: i32, %arg1: i32, %arg2: memref<2xi32, #tpu.memory_space<smem>>, %arg3: memref<2xi32, #tpu.memory_space<smem>>) -> (i32, i32) {
    %0 = arith.index_cast %arg0 : i32 to index
    %1 = memref.load %arg2[%0] : memref<2xi32, #tpu.memory_space<smem>>
    %2 = arith.index_cast %arg0 : i32 to index
    %3 = memref.load %arg3[%2] : memref<2xi32, #tpu.memory_space<smem>>
    %c1_i32 = arith.constant 1 : i32
    %4 = arith.subi %3, %c1_i32 : i32
    %c0_i32 = arith.constant 0 : i32
    %5 = arith.maxsi %4, %c0_i32 : i32
    %6 = arith.minsi %arg1, %5 : i32
    %7 = arith.addi %1, %6 : i32
    %c0_i32_0 = arith.constant 0 : i32
    %c0_i32_1 = arith.constant 0 : i32
    return %c0_i32_0, %7 : i32, i32
  }
  func.func @transform_1(%arg0: i32, %arg1: i32, %arg2: memref<2xi32, #tpu.memory_space<smem>>, %arg3: memref<2xi32, #tpu.memory_space<smem>>) -> (i32, i32) {
    %0 = arith.index_cast %arg0 : i32 to index
    %1 = memref.load %arg2[%0] : memref<2xi32, #tpu.memory_space<smem>>
    %2 = arith.index_cast %arg0 : i32 to index
    %3 = memref.load %arg3[%2] : memref<2xi32, #tpu.memory_space<smem>>
    %c1_i32 = arith.constant 1 : i32
    %4 = arith.subi %3, %c1_i32 : i32
    %c0_i32 = arith.constant 0 : i32
    %5 = arith.maxsi %4, %c0_i32 : i32
    %6 = arith.minsi %arg1, %5 : i32
    %7 = arith.addi %1, %6 : i32
    %c0_i32_0 = arith.constant 0 : i32
    %c0_i32_1 = arith.constant 0 : i32
    return %7, %c0_i32_0 : i32, i32
  }
  func.func @transform_2(%arg0: i32, %arg1: i32, %arg2: memref<2xi32, #tpu.memory_space<smem>>, %arg3: memref<2xi32, #tpu.memory_space<smem>>) -> (i32, i32) {
    %c0_i32 = arith.constant 0 : i32
    %c0_i32_0 = arith.constant 0 : i32
    return %arg0, %c0_i32 : i32, i32
  }
  func.func @transform_3(%arg0: i32, %arg1: i32, %arg2: memref<2xi32, #tpu.memory_space<smem>>, %arg3: memref<2xi32, #tpu.memory_space<smem>>) -> (i32, i32) {
    %c0_i32 = arith.constant 0 : i32
    %c0_i32_0 = arith.constant 0 : i32
    return %arg0, %c0_i32 : i32, i32
  }
}

</mosaic_0001>

<bundles_post_ra>
// kernel: tpu_custom_call.1
= control target key start
LH: loop header
LB: loop body
LE: loop exit
PB: predicated region body
PF: predicated region fallthrough
CT: control target
= control target key end

     0   :  { %s1461_s24 = smov [#allocation4]   ;;  %s1462_s25 = smov [#allocation5]   ;;  %s1884_s0 = inlined_call_operand.vmem [shape: s32[2], index: 0, kind: input, shape index: {}]   ;;  %s1885_s2 = inlined_call_operand.vmem [shape: s32[1,512], index: 2, kind: input, shape index: {}]   ;;  %s1886_s3 = inlined_call_operand.vmem [shape: f32[512,3], index: 3, kind: input, shape index: {}]   ;;  %s1887_s4 = inlined_call_operand.vmem [shape: f32[256,1], index: 4, kind: input, shape index: {}]   ;;  %s1888_s5 = inlined_call_operand.vmem [shape: f32[256,3], index: 5, kind: output, shape index: {}]   ;;  %s1889_s1 = inlined_call_operand.vmem [shape: s32[2], index: 1, kind: input, shape index: {}]  }
   0x1   :  { %s11_s20 = sshll.u32 %s1884_s0, 4  ;;  %s16_s23 = sshll.u32 %s1889_s1, 4  ;;  %s12_s20 = int_to_ptr.vmem [resolvable:$true] %s11_s20  ;;  %s17_s23 = int_to_ptr.vmem [resolvable:$true] %s16_s23 }
   0x2   :  { %14 = dma.vmem_to_smem %s12_s20, 16, %s1461_s24, [#allocation3] }
   0x3   :  { %19 = dma.vmem_to_smem %s17_s23, 16, %s1462_s25, [#allocation3] }
   0x4   :  { %1447 = dma.done.wait [#allocation3], 32 }
   0x5   :  { %1448 = vsyncadd [#allocation3], 4294967264 }
   0x6   :  { %22 = sfence }
   0x7   :  { %s1502_s26 = smov 0   ;;  %s1504_s27 = smov 0  }
   0x8   :  { %s1506_s28 = smov 0  }
   0x9 LB: > { %s40_s0 = sadd.s32 1, %s1455_s27  ;;  %p1216_p0 = scmp.ge.s32.totalorder %s1459_s28, 1  ;;  %s1459_s28 = sphi %s1506_s28, %s28_s28   ;;  %s1455_s27 = sphi %s1504_s27, %s1893_s27   ;;  %s1451_s26 = sphi %s1502_s26, %s1892_s26  }
   0xa   : > { %p42_p1 = scmp.ge.s32.totalorder %s40_s0, 2  ;;  %p250_p2 = scmp.lt.s32.totalorder %s1459_s28, 3 }
   0xc   : > { %s1895_s0 = smov (%p42_p1, %s40_s0), 0  ;;  %p251_p3 = pnand %p1216_p0, %p250_p2 }
   0xd   : > { %s1224_s1 = sshll.u32 (!%p251_p3), %s1451_s26, 4  ;;  %s300_s29 = sld [smem:[#allocation5 + %s1451_s26]] (!%p251_p3) }
   0xe   : > { %254 = sbr.rel (%p251_p3) target bundleno = 489 (0x1e9), region = 32  ;;  %p343_p4 = scmp.lt.s32.totalorder (!%p251_p3), %s1224_s1, 31 }
   0xf   : > { %s321_s30 = sld [smem:[#allocation5 + %s1451_s26]] (!%p251_p3) }
  0x10   : > { %s1531_s6 = sld [smem:[#allocation5 + %s1451_s26]] (!%p251_p3) }
  0x11   : > { %s299_s7 = sld [smem:[#allocation4 + %s1451_s26]] (!%p251_p3) }
  0x12   : > { %s320_s18 = sld [smem:[#allocation4 + %s1451_s26]] (!%p251_p3) }
  0x13   : > { %vm358_vm0 = vcmask 23552   ;;  %v1463_v0 = vmov 0.0   ;;  %s1897_s1 = smov (!%p343_p4, %s1224_s1), 31  ;;  %s1217_s9 = sadd.s32 4294967295, %s300_s29 }
  0x14   : > { %359 = vst.msk [vmem:[#allocation2] sm:$0xff] %vm358_vm0, %v1463_v0  ;;  %s1225_s8 = sshll.u32 %s1897_s1, 3  ;;  %p1541_p5 = scmp.gt.s32.totalorder %s1217_s9, 0 }
  0x15   : > { %360 = vst.msk [vmem:[#allocation2 + $0x8] sm:$0xff] %vm358_vm0, %v1463_v0  ;;  %s1538_s12 = scalar_lea.vmem %s1887_s4, %s1225_s8  ;;  %s1548_s16 = scalar_lea.vmem %s1888_s5, %s1225_s8 }
  0x16   : > { %361 = vst.msk [vmem:[#allocation2 + $0x10] sm:$0xff] %vm358_vm0, %v1463_v0  ;;  %s1220_s17 = sadd.s32 4294967295, %s321_s30  ;;  %s1899_s9 = smov (!%p1541_p5, %s1217_s9), 0 }
  0x17   : > { %362 = vst.msk [vmem:[#allocation2 + $0x18] sm:$0xff] %vm358_vm0, %v1463_v0  ;;  %p1556_p6 = scmp.gt.s32.totalorder %s1220_s17, 0  ;;  %s1901_s9 = smov (%p1541_p5, %s1899_s9), 0 }
  0x18   : > { %363 = vst.msk [vmem:[#allocation2 + $0x20] sm:$0xff] %vm358_vm0, %v1463_v0  ;;  %s306_s20 = sadd.s32 %s1901_s9, %s299_s7  ;;  %p1229_p9 = scmp.le.s32.totalorder %s1531_s6, 0 }
  0x19   : > { %364 = vst.msk [vmem:[#allocation2 + $0x28] sm:$0xff] %vm358_vm0, %v1463_v0  ;;  %s1903_s17 = smov (!%p1556_p6, %s1220_s17), 0  ;;  %s1219_s21 = sshll.u32 %s306_s20, 2 }
  0x1a   : > { %365 = vst.msk [vmem:[#allocation2 + $0x30] sm:$0xff] %vm358_vm0, %v1463_v0  ;;  %p308_p7 = scmp.lt.s32.totalorder %s1219_s21, 3  ;;  %s1905_s17 = smov (%p1556_p6, %s1903_s17), 0 }
  0x1b   : > { %366 = vst.msk [vmem:[#allocation2 + $0x38] sm:$0xff] %vm358_vm0, %v1463_v0  ;;  %s327_s22 = sadd.s32 %s1905_s17, %s320_s18  ;;  %s1230_s6 = sshll.u32 (!%p1229_p9), %s1451_s26, 7 }
  0x1c   : > { %367 = vst.msk [vmem:[#allocation2 + $0x40] sm:$0xff] %vm358_vm0, %v1463_v0  ;;  %s1907_s21 = smov (!%p308_p7, %s1219_s21), 3  ;;  %s1222_s1 = sshll.u32 %s327_s22, 6 }
  0x1d   : > { %368 = vst.msk [vmem:[#allocation2 + $0x48] sm:$0xff] %vm358_vm0, %v1463_v0  ;;  %s310_s25 = scalar_lea.vmem %s1885_s2, %s1907_s21  ;;  %p329_p8 = scmp.lt.s32.totalorder %s1222_s1, 63 }
  0x1e   : > { %369 = vst.msk [vmem:[#allocation2 + $0x50] sm:$0xff] %vm358_vm0, %v1463_v0 }
  0x1f   : > { %370 = vst.msk [vmem:[#allocation2 + $0x58] sm:$0xff] %vm358_vm0, %v1463_v0  ;;  %s1909_s1 = smov (!%p329_p8, %s1222_s1), 63  ;;  %379 = sbr.rel (%p1229_p9) target bundleno = 328 (0x148), region = 40 }
  0x20   : > { %371 = vst.msk [vmem:[#allocation2 + $0x60] sm:$0xff] %vm358_vm0, %v1463_v0  ;;  %s1223_s29 = sshll.u32 %s1909_s1, 3 }
  0x21   : > { %372 = vst.msk [vmem:[#allocation2 + $0x68] sm:$0xff] %vm358_vm0, %v1463_v0  ;;  %s1581_s8 = scalar_lea.vmem %s1886_s3, %s1223_s29 }
  0x22   : > { %373 = vst.msk [vmem:[#allocation2 + $0x70] sm:$0xff] %vm358_vm0, %v1463_v0 }
  0x23   : > { %374 = vst.msk [vmem:[#allocation2 + $0x78] sm:$0xff] %vm358_vm0, %v1463_v0 }
  0x24   : > { %v660_v1 = vld [vmem:[%s1581_s8 + $0x178] sm:$0xff]  ;;  %v659_v2 = vld [vmem:[%s1581_s8 + $0x170] sm:$0xff]  ;;  %v658_v6 = vld [vmem:[%s1581_s8 + $0x168] sm:$0xff]  ;;  %v382_v43 = vstv %s1230_s6  ;;  %v384_v52 = vlaneseq }
  0x25   : > { %v676_v3 = vld [vmem:[%s1581_s8 + $0x1f8] sm:$0xff]  ;;  %807 = vmatpush.msra.mxu2 %v660_v1  ;;  %v675_v7 = vld [vmem:[%s1581_s8 + $0x1f0] sm:$0xff]  ;;  %v674_v10 = vld [vmem:[%s1581_s8 + $0x1e8] sm:$0xff] }
  0x26   : > { %872 = vmatpush.msra.mxu3 %v676_v3  ;;  %v628_v4 = vld [vmem:[%s1581_s8 + $0x78] sm:$0xff]  ;;  %v627_v8 = vld [vmem:[%s1581_s8 + $0x70] sm:$0xff]  ;;  %v626_v11 = vld [vmem:[%s1581_s8 + $0x68] sm:$0xff]  ;;  %v1646_v61 = vshrl.u32 %v384_v52, 7 }
  0x27   : > { %v644_v5 = vld [vmem:[%s1581_s8 + $0xf8] sm:$0xff]  ;;  %677 = vmatpush.msra.mxu0 %v628_v4  ;;  %v643_v9 = vld [vmem:[%s1581_s8 + $0xf0] sm:$0xff]  ;;  %808 = vmatpush.msra.mxu2 %v659_v2  ;;  %v657_v12 = vld [vmem:[%s1581_s8 + $0x160] sm:$0xff] }
  0x28   : > { %742 = vmatpush.msra.mxu1 %v644_v5  ;;  %873 = vmatpush.msra.mxu3 %v675_v7  ;;  %v642_v13 = vld [vmem:[%s1581_s8 + $0xe8] sm:$0xff]  ;;  %v673_v14 = vld [vmem:[%s1581_s8 + $0x1e0] sm:$0xff]  ;;  %v656_v17 = vld [vmem:[%s1581_s8 + $0x158] sm:$0xff] }
  0x29   : > { %678 = vmatpush.msra.mxu0 %v627_v8  ;;  %809 = vmatpush.msra.mxu2 %v658_v6  ;;  %v625_v15 = vld [vmem:[%s1581_s8 + $0x60] sm:$0xff]  ;;  %v672_v18 = vld [vmem:[%s1581_s8 + $0x1d8] sm:$0xff]  ;;  %v655_v21 = vld [vmem:[%s1581_s8 + $0x150] sm:$0xff] }
  0x2a   : > { %743 = vmatpush.msra.mxu1 %v643_v9  ;;  %874 = vmatpush.msra.mxu3 %v674_v10  ;;  %v641_v16 = vld [vmem:[%s1581_s8 + $0xe0] sm:$0xff]  ;;  %v624_v19 = vld [vmem:[%s1581_s8 + $0x58] sm:$0xff]  ;;  %v671_v22 = vld [vmem:[%s1581_s8 + $0x1d0] sm:$0xff]  ;;  %v1464_v10 = vmov 1.0  }
  0x2b   : > { %679 = vmatpush.msra.mxu0 %v626_v11  ;;  %810 = vmatpush.msra.mxu2 %v657_v12  ;;  %v640_v20 = vld [vmem:[%s1581_s8 + $0xd8] sm:$0xff]  ;;  %v623_v23 = vld [vmem:[%s1581_s8 + $0x50] sm:$0xff]  ;;  %v654_v25 = vld [vmem:[%s1581_s8 + $0x148] sm:$0xff]  ;;  %v386_v11 = vadd.s32 8, %v1646_v61  ;;  %v387_v12 = vadd.s32 16, %v1646_v61 }
  0x2c   : > { %744 = vmatpush.msra.mxu1 %v642_v13  ;;  %875 = vmatpush.msra.mxu3 %v673_v14  ;;  %v639_v24 = vld [vmem:[%s1581_s8 + $0xd0] sm:$0xff]  ;;  %v670_v26 = vld [vmem:[%s1581_s8 + $0x1c8] sm:$0xff]  ;;  %v653_v29 = vld [vmem:[%s1581_s8 + $0x140] sm:$0xff]  ;;  %v388_v13 = vadd.s32 24, %v1646_v61  ;;  %v389_v14 = vadd.s32 32, %v1646_v61 }
  0x2d   : > { %680 = vmatpush.msra.mxu0 %v625_v15  ;;  %811 = vmatpush.msra.mxu2 %v656_v17  ;;  %v622_v27 = vld [vmem:[%s1581_s8 + $0x48] sm:$0xff]  ;;  %v669_v30 = vld [vmem:[%s1581_s8 + $0x1c0] sm:$0xff]  ;;  %v652_v33 = vld [vmem:[%s1581_s8 + $0x138] sm:$0xff]  ;;  %v390_v15 = vadd.s32 40, %v1646_v61  ;;  %v392_v17 = vadd.s32 56, %v1646_v61 }
  0x2e   : > { %745 = vmatpush.msra.mxu1 %v641_v16  ;;  %876 = vmatpush.msra.mxu3 %v672_v18  ;;  %v638_v28 = vld [vmem:[%s1581_s8 + $0xc8] sm:$0xff]  ;;  %v621_v31 = vld [vmem:[%s1581_s8 + $0x40] sm:$0xff]  ;;  %v668_v34 = vld [vmem:[%s1581_s8 + $0x1b8] sm:$0xff]  ;;  %v391_v16 = vadd.s32 48, %v1646_v61  ;;  %v393_v18 = vadd.s32 64, %v1646_v61 }
  0x2f   : > { %681 = vmatpush.msra.mxu0 %v624_v19  ;;  %812 = vmatpush.msra.mxu2 %v655_v21  ;;  %v637_v32 = vld [vmem:[%s1581_s8 + $0xc0] sm:$0xff]  ;;  %v620_v35 = vld [vmem:[%s1581_s8 + $0x38] sm:$0xff]  ;;  %v651_v37 = vld [vmem:[%s1581_s8 + $0x130] sm:$0xff]  ;;  %v394_v19 = vadd.s32 72, %v1646_v61  ;;  %v396_v21 = vadd.s32 88, %v1646_v61 }
  0x30   : > { %746 = vmatpush.msra.mxu1 %v640_v20  ;;  %877 = vmatpush.msra.mxu3 %v671_v22  ;;  %v636_v36 = vld [vmem:[%s1581_s8 + $0xb8] sm:$0xff]  ;;  %v667_v38 = vld [vmem:[%s1581_s8 + $0x1b0] sm:$0xff]  ;;  %v650_v41 = vld [vmem:[%s1581_s8 + $0x128] sm:$0xff]  ;;  %v395_v20 = vadd.s32 80, %v1646_v61  ;;  %v397_v22 = vadd.s32 96, %v1646_v61 }
  0x31   : > { %682 = vmatpush.msra.mxu0 %v623_v23  ;;  %813 = vmatpush.msra.mxu2 %v654_v25  ;;  %v619_v39 = vld [vmem:[%s1581_s8 + $0x30] sm:$0xff]  ;;  %v666_v42 = vld [vmem:[%s1581_s8 + $0x1a8] sm:$0xff]  ;;  %v380_v46 = vld [vmem:[%s310_s25] sm:$0xf]  ;;  %v398_v23 = vadd.s32 104, %v1646_v61  ;;  %v400_v25 = vadd.s32 120, %v1646_v61 }
  0x32   : > { %747 = vmatpush.msra.mxu1 %v639_v24  ;;  %878 = vmatpush.msra.mxu3 %v670_v26  ;;  %v635_v40 = vld [vmem:[%s1581_s8 + $0xb0] sm:$0xff]  ;;  %v618_v44 = vld [vmem:[%s1581_s8 + $0x28] sm:$0xff]  ;;  %v649_v47 = vld [vmem:[%s1581_s8 + $0x120] sm:$0xff]  ;;  %v383_v51 = vsub.s32 %v380_v46, %v382_v43  ;;  %v399_v24 = vadd.s32 112, %v1646_v61 }
  0x33   : > { %683 = vmatpush.msra.mxu0 %v622_v27  ;;  %814 = vmatpush.msra.mxu2 %v653_v29  ;;  %v634_v45 = vld [vmem:[%s1581_s8 + $0xa8] sm:$0xff]  ;;  %v665_v48 = vld [vmem:[%s1581_s8 + $0x1a0] sm:$0xff]  ;;  %v648_v53 = vld [vmem:[%s1581_s8 + $0x118] sm:$0xff] }
  0x34   : > { %748 = vmatpush.msra.mxu1 %v638_v28  ;;  %879 = vmatpush.msra.mxu3 %v669_v30  ;;  %v617_v49 = vld [vmem:[%s1581_s8 + $0x20] sm:$0xff]  ;;  %v664_v54 = vld [vmem:[%s1581_s8 + $0x198] sm:$0xff]  ;;  %v647_v57 = vld [vmem:[%s1581_s8 + $0x110] sm:$0xff]  ;;  %v1648_v62 = vperm.slane %v383_v51, 2  ;;  %v1650_v63 = vperm.slane %v383_v51, 3  ;;  %v1656_v4 = vperm.slane %v383_v51, 0 }
  0x35   : > { %684 = vmatpush.msra.mxu0 %v621_v31  ;;  %815 = vmatpush.msra.mxu2 %v652_v33  ;;  %v633_v50 = vld [vmem:[%s1581_s8 + $0xa0] sm:$0xff]  ;;  %v616_v55 = vld [vmem:[%s1581_s8 + $0x18] sm:$0xff]  ;;  %v663_v58 = vld [vmem:[%s1581_s8 + $0x190] sm:$0xff]  ;;  %v1658_v5 = vperm.slane %v383_v51, 1 }
  0x36   : > { %749 = vmatpush.msra.mxu1 %v637_v32  ;;  %880 = vmatpush.msra.mxu3 %v668_v34  ;;  %v632_v56 = vld [vmem:[%s1581_s8 + $0x98] sm:$0xff]  ;;  %v615_v59 = vld [vmem:[%s1581_s8 + $0x10] sm:$0xff]  ;;  %v646_v0 = vld [vmem:[%s1581_s8 + $0x108] sm:$0xff]  ;;  %vm407_vm1 = vcmp.eq.s32.totalorder %v1646_v61, %v1648_v62  ;;  %vm408_vm2 = vcmp.eq.s32.totalorder %v1646_v61, %v1650_v63  ;;  %vm405_vm3 = vcmp.eq.s32.totalorder %v1646_v61, %v1656_v4 }
  0x37   : > { %685 = vmatpush.msra.mxu0 %v620_v35  ;;  %816 = vmatpush.msra.mxu2 %v651_v37  ;;  %v631_v60 = vld [vmem:[%s1581_s8 + $0x90] sm:$0xff]  ;;  %v662_v1 = vld [vmem:[%s1581_s8 + $0x188] sm:$0xff]  ;;  %v645_v6 = vld [vmem:[%s1581_s8 + $0x100] sm:$0xff]  ;;  %vm406_vm4 = vcmp.eq.s32.totalorder %v1646_v61, %v1658_v5  ;;  %vm411_vm5 = vcmp.eq.s32.totalorder %v386_v11, %v1648_v62  ;;  %vm412_vm6 = vcmp.eq.s32.totalorder %v386_v11, %v1650_v63 }
  0x38   : > { %750 = vmatpush.msra.mxu1 %v636_v36  ;;  %881 = vmatpush.msra.mxu3 %v667_v38  ;;  %v614_v2 = vld [vmem:[%s1581_s8 + $0x8] sm:$0xff]  ;;  %v661_v7 = vld [vmem:[%s1581_s8 + $0x180] sm:$0xff]  ;;  %vm409_vm7 = vcmp.eq.s32.totalorder %v386_v11, %v1656_v4  ;;  %vm410_vm8 = vcmp.eq.s32.totalorder %v386_v11, %v1658_v5  ;;  %vm415_vm9 = vcmp.eq.s32.totalorder %v387_v12, %v1648_v62 }
  0x39   : > { %686 = vmatpush.msra.mxu0 %v619_v39  ;;  %817 = vmatpush.msra.mxu2 %v650_v41  ;;  %v630_v3 = vld [vmem:[%s1581_s8 + $0x88] sm:$0xff]  ;;  %v613_v8 = vld [vmem:[%s1581_s8] sm:$0xff]  ;;  %vm416_vm10 = vcmp.eq.s32.totalorder %v387_v12, %v1650_v63  ;;  %vm413_vm11 = vcmp.eq.s32.totalorder %v387_v12, %v1656_v4  ;;  %vm414_vm12 = vcmp.eq.s32.totalorder %v387_v12, %v1658_v5 }
  0x3a   : > { %751 = vmatpush.msra.mxu1 %v635_v40  ;;  %882 = vmatpush.msra.mxu3 %v666_v42  ;;  %v629_v9 = vld [vmem:[%s1581_s8 + $0x80] sm:$0xff]  ;;  %vm419_vm13 = vcmp.eq.s32.totalorder %v388_v13, %v1648_v62  ;;  %vm420_vm14 = vcmp.eq.s32.totalorder %v388_v13, %v1650_v63  ;;  %vm417_vm15 = vcmp.eq.s32.totalorder %v388_v13, %v1656_v4  ;;  %v598_v41 = vld [vmem:[#allocation2 + $0x8] sm:$0xff] }
  0x3b   : > { %687 = vmatpush.msra.mxu0 %v618_v44  ;;  %818 = vmatpush.msra.mxu2 %v649_v47  ;;  %v597_v32 = vld [vmem:[#allocation2] sm:$0xff] }
  0x3c   : > { %752 = vmatpush.msra.mxu1 %v634_v45  ;;  %883 = vmatpush.msra.mxu3 %v665_v48 }
  0x3d   : > { %688 = vmatpush.msra.mxu0 %v617_v49  ;;  %819 = vmatpush.msra.mxu2 %v648_v53 }
  0x3e   : > { %753 = vmatpush.msra.mxu1 %v633_v50  ;;  %884 = vmatpush.msra.mxu3 %v664_v54  ;;  %v599_v50 = vld [vmem:[#allocation2 + $0x10] sm:$0xff] }
  0x3f   : > { %689 = vmatpush.msra.mxu0 %v616_v55  ;;  %820 = vmatpush.msra.mxu2 %v647_v57 }
  0x40   : > { %754 = vmatpush.msra.mxu1 %v632_v56  ;;  %885 = vmatpush.msra.mxu3 %v663_v58 }
  0x41   : > { %690 = vmatpush.msra.mxu0 %v615_v59  ;;  %821 = vmatpush.msra.mxu2 %v646_v0  ;;  %v600_v59 = vld [vmem:[#allocation2 + $0x18] sm:$0xff] }
  0x42   : > { %755 = vmatpush.msra.mxu1 %v631_v60  ;;  %886 = vmatpush.msra.mxu3 %v662_v1 }
  0x43   : > { %691 = vmatpush.msra.mxu0 %v614_v2  ;;  %822 = vmatpush.msra.mxu2 %v645_v6 }
  0x44   : > { %756 = vmatpush.msra.mxu1 %v630_v3  ;;  %887 = vmatpush.msra.mxu3 %v661_v7 }
  0x45   : > { %1327 = vmatmul.msk.f32.vlgmr.msra.gmra.mxu2 %vm407_vm1, %v1464_v10  ;;  %1343 = vmatmul.msk.f32.vlgmr.msra.gmra.mxu3 %vm408_vm2, %v1464_v10  ;;  %vm418_vm1 = vcmp.eq.s32.totalorder %v388_v13, %v1658_v5  ;;  %vm423_vm2 = vcmp.eq.s32.totalorder %v389_v14, %v1648_v62  ;;  %v602_v13 = vld [vmem:[#allocation2 + $0x28] sm:$0xff] }
  0x46   : > { %692 = vmatpush.msra.mxu0 %v613_v8  ;;  %757 = vmatpush.msra.mxu1 %v629_v9 }
  0x47   : > { %1295 = vmatmul.msk.f32.vlgmr.msra.gmra.mxu0 %vm405_vm3, %v1464_v10  ;;  %1311 = vmatmul.msk.f32.vlgmr.msra.gmra.mxu1 %vm406_vm4, %v1464_v10  ;;  %vm424_vm3 = vcmp.eq.s32.totalorder %v389_v14, %v1650_v63  ;;  %vm421_vm4 = vcmp.eq.s32.totalorder %v389_v14, %v1656_v4 }
  0x4d   : > { %1328 = vmatmul.msk.f32.gmra.mxu2 %vm411_vm5, %v1464_v10  ;;  %1344 = vmatmul.msk.f32.gmra.mxu3 %vm412_vm6, %v1464_v10  ;;  %vm422_vm5 = vcmp.eq.s32.totalorder %v389_v14, %v1658_v5  ;;  %vm427_vm6 = vcmp.eq.s32.totalorder %v390_v15, %v1648_v62 }
  0x4f   : > { %1296 = vmatmul.msk.f32.gmra.mxu0 %vm409_vm7, %v1464_v10  ;;  %1312 = vmatmul.msk.f32.gmra.mxu1 %vm410_vm8, %v1464_v10  ;;  %vm428_vm7 = vcmp.eq.s32.totalorder %v390_v15, %v1650_v63  ;;  %vm425_vm8 = vcmp.eq.s32.totalorder %v390_v15, %v1656_v4 }
  0x55   : > { %1329 = vmatmul.msk.f32.gmra.mxu2 %vm415_vm9, %v1464_v10  ;;  %1345 = vmatmul.msk.f32.gmra.mxu3 %vm416_vm10, %v1464_v10  ;;  %vm426_vm9 = vcmp.eq.s32.totalorder %v390_v15, %v1658_v5  ;;  %vm431_vm10 = vcmp.eq.s32.totalorder %v391_v16, %v1648_v62 }
  0x57   : > { %1297 = vmatmul.msk.f32.gmra.mxu0 %vm413_vm11, %v1464_v10  ;;  %1313 = vmatmul.msk.f32.gmra.mxu1 %vm414_vm12, %v1464_v10  ;;  %vm432_vm11 = vcmp.eq.s32.totalorder %v391_v16, %v1650_v63  ;;  %vm429_vm12 = vcmp.eq.s32.totalorder %v391_v16, %v1656_v4 }
  0x5d   : > { %1330 = vmatmul.msk.f32.gmra.mxu2 %vm419_vm13, %v1464_v10  ;;  %1346 = vmatmul.msk.f32.gmra.mxu3 %vm420_vm14, %v1464_v10  ;;  %vm430_vm13 = vcmp.eq.s32.totalorder %v391_v16, %v1658_v5  ;;  %vm435_vm14 = vcmp.eq.s32.totalorder %v392_v17, %v1648_v62 }
  0x5f   : > { %1298 = vmatmul.msk.f32.gmra.mxu0 %vm417_vm15, %v1464_v10  ;;  %1314 = vmatmul.msk.f32.gmra.mxu1 %vm418_vm1, %v1464_v10  ;;  %vm436_vm15 = vcmp.eq.s32.totalorder %v392_v17, %v1650_v63  ;;  %vm433_vm1 = vcmp.eq.s32.totalorder %v392_v17, %v1656_v4 }
  0x65   : > { %1331 = vmatmul.msk.f32.gmra.mxu2 %vm423_vm2, %v1464_v10  ;;  %1347 = vmatmul.msk.f32.gmra.mxu3 %vm424_vm3, %v1464_v10  ;;  %vm434_vm2 = vcmp.eq.s32.totalorder %v392_v17, %v1658_v5  ;;  %vm439_vm3 = vcmp.eq.s32.totalorder %v393_v18, %v1648_v62 }
  0x67   : > { %1299 = vmatmul.msk.f32.gmra.mxu0 %vm421_vm4, %v1464_v10  ;;  %1315 = vmatmul.msk.f32.gmra.mxu1 %vm422_vm5, %v1464_v10  ;;  %vm440_vm4 = vcmp.eq.s32.totalorder %v393_v18, %v1650_v63  ;;  %vm437_vm5 = vcmp.eq.s32.totalorder %v393_v18, %v1656_v4 }
  0x6d   : > { %1332 = vmatmul.msk.f32.gmra.mxu2 %vm427_vm6, %v1464_v10  ;;  %1348 = vmatmul.msk.f32.gmra.mxu3 %vm428_vm7, %v1464_v10  ;;  %vm438_vm6 = vcmp.eq.s32.totalorder %v393_v18, %v1658_v5  ;;  %vm443_vm7 = vcmp.eq.s32.totalorder %v394_v19, %v1648_v62 }
  0x6f   : > { %1300 = vmatmul.msk.f32.gmra.mxu0 %vm425_vm8, %v1464_v10  ;;  %1316 = vmatmul.msk.f32.gmra.mxu1 %vm426_vm9, %v1464_v10  ;;  %vm444_vm8 = vcmp.eq.s32.totalorder %v394_v19, %v1650_v63  ;;  %vm441_vm9 = vcmp.eq.s32.totalorder %v394_v19, %v1656_v4 }
  0x75   : > { %1333 = vmatmul.msk.f32.gmra.mxu2 %vm431_vm10, %v1464_v10  ;;  %1349 = vmatmul.msk.f32.gmra.mxu3 %vm432_vm11, %v1464_v10  ;;  %vm442_vm10 = vcmp.eq.s32.totalorder %v394_v19, %v1658_v5  ;;  %vm447_vm11 = vcmp.eq.s32.totalorder %v395_v20, %v1648_v62 }
  0x77   : > { %1301 = vmatmul.msk.f32.gmra.mxu0 %vm429_vm12, %v1464_v10  ;;  %1317 = vmatmul.msk.f32.gmra.mxu1 %vm430_vm13, %v1464_v10  ;;  %vm448_vm12 = vcmp.eq.s32.totalorder %v395_v20, %v1650_v63  ;;  %vm445_vm13 = vcmp.eq.s32.totalorder %v395_v20, %v1656_v4 }
  0x7d   : > { %1334 = vmatmul.msk.f32.gmra.mxu2 %vm435_vm14, %v1464_v10  ;;  %1350 = vmatmul.msk.f32.gmra.mxu3 %vm436_vm15, %v1464_v10  ;;  %vm446_vm14 = vcmp.eq.s32.totalorder %v395_v20, %v1658_v5  ;;  %vm451_vm15 = vcmp.eq.s32.totalorder %v396_v21, %v1648_v62 }
  0x7f   : > { %1302 = vmatmul.msk.f32.gmra.mxu0 %vm433_vm1, %v1464_v10  ;;  %1318 = vmatmul.msk.f32.gmra.mxu1 %vm434_vm2, %v1464_v10  ;;  %vm452_vm1 = vcmp.eq.s32.totalorder %v396_v21, %v1650_v63  ;;  %vm449_vm2 = vcmp.eq.s32.totalorder %v396_v21, %v1656_v4 }
  0x85   : > { %1335 = vmatmul.msk.f32.gmra.mxu2 %vm439_vm3, %v1464_v10  ;;  %1351 = vmatmul.msk.f32.gmra.mxu3 %vm440_vm4, %v1464_v10  ;;  %vm450_vm3 = vcmp.eq.s32.totalorder %v396_v21, %v1658_v5  ;;  %vm455_vm4 = vcmp.eq.s32.totalorder %v397_v22, %v1648_v62 }
  0x87   : > { %1303 = vmatmul.msk.f32.gmra.mxu0 %vm437_vm5, %v1464_v10  ;;  %1319 = vmatmul.msk.f32.gmra.mxu1 %vm438_vm6, %v1464_v10  ;;  %vm456_vm5 = vcmp.eq.s32.totalorder %v397_v22, %v1650_v63  ;;  %vm453_vm6 = vcmp.eq.s32.totalorder %v397_v22, %v1656_v4 }
  0x8d   : > { %1336 = vmatmul.msk.f32.gmra.mxu2 %vm443_vm7, %v1464_v10  ;;  %1352 = vmatmul.msk.f32.gmra.mxu3 %vm444_vm8, %v1464_v10  ;;  %vm454_vm7 = vcmp.eq.s32.totalorder %v397_v22, %v1658_v5  ;;  %vm459_vm8 = vcmp.eq.s32.totalorder %v398_v23, %v1648_v62  ;;  %v603_v22 = vld [vmem:[#allocation2 + $0x30] sm:$0xff] }
  0x8f   : > { %1304 = vmatmul.msk.f32.gmra.mxu0 %vm441_vm9, %v1464_v10  ;;  %1320 = vmatmul.msk.f32.gmra.mxu1 %vm442_vm10, %v1464_v10  ;;  %vm460_vm9 = vcmp.eq.s32.totalorder %v398_v23, %v1650_v63  ;;  %vm457_vm10 = vcmp.eq.s32.totalorder %v398_v23, %v1656_v4 }
  0x95   : > { %1337 = vmatmul.msk.f32.gmra.mxu2 %vm447_vm11, %v1464_v10  ;;  %1353 = vmatmul.msk.f32.gmra.mxu3 %vm448_vm12, %v1464_v10  ;;  %vm458_vm11 = vcmp.eq.s32.totalorder %v398_v23, %v1658_v5  ;;  %vm463_vm12 = vcmp.eq.s32.totalorder %v399_v24, %v1648_v62 }
  0x97   : > { %1305 = vmatmul.msk.f32.gmra.mxu0 %vm445_vm13, %v1464_v10  ;;  %1321 = vmatmul.msk.f32.gmra.mxu1 %vm446_vm14, %v1464_v10  ;;  %vm464_vm13 = vcmp.eq.s32.totalorder %v399_v24, %v1650_v63  ;;  %vm461_vm14 = vcmp.eq.s32.totalorder %v399_v24, %v1656_v4 }
  0x9d   : > { %1338 = vmatmul.msk.f32.gmra.mxu2 %vm451_vm15, %v1464_v10  ;;  %1354 = vmatmul.msk.f32.gmra.mxu3 %vm452_vm1, %v1464_v10  ;;  %vm462_vm15 = vcmp.eq.s32.totalorder %v399_v24, %v1658_v5  ;;  %vm467_vm1 = vcmp.eq.s32.totalorder %v400_v25, %v1648_v62 }
  0x9f   : > { %1306 = vmatmul.msk.f32.gmra.mxu0 %vm449_vm2, %v1464_v10  ;;  %1322 = vmatmul.msk.f32.gmra.mxu1 %vm450_vm3, %v1464_v10  ;;  %vm468_vm2 = vcmp.eq.s32.totalorder %v400_v25, %v1650_v63  ;;  %vm465_vm3 = vcmp.eq.s32.totalorder %v400_v25, %v1656_v4  ;;  %v601_v4 = vld [vmem:[#allocation2 + $0x20] sm:$0xff] }
  0xa5   : > { %1339 = vmatmul.msk.f32.gmra.mxu2 %vm455_vm4, %v1464_v10  ;;  %1355 = vmatmul.msk.f32.gmra.mxu3 %vm456_vm5, %v1464_v10  ;;  %vm466_vm4 = vcmp.eq.s32.totalorder %v400_v25, %v1658_v5 }
  0xa7   : > { %1307 = vmatmul.msk.f32.gmra.mxu0 %vm453_vm6, %v1464_v10  ;;  %1323 = vmatmul.msk.f32.gmra.mxu1 %vm454_vm7, %v1464_v10 }
  0xad   : > { %1340 = vmatmul.msk.f32.gmra.mxu2 %vm459_vm8, %v1464_v10  ;;  %1356 = vmatmul.msk.f32.gmra.mxu3 %vm460_vm9, %v1464_v10 }
  0xaf   : > { %1308 = vmatmul.msk.f32.gmra.mxu0 %vm457_vm10, %v1464_v10  ;;  %1324 = vmatmul.msk.f32.gmra.mxu1 %vm458_vm11, %v1464_v10 }
  0xb5   : > { %1341 = vmatmul.msk.f32.gmra.mxu2 %vm463_vm12, %v1464_v10  ;;  %1357 = vmatmul.msk.f32.gmra.mxu3 %vm464_vm13, %v1464_v10 }
  0xb7   : > { %1309 = vmatmul.msk.f32.gmra.mxu0 %vm461_vm14, %v1464_v10  ;;  %1325 = vmatmul.msk.f32.gmra.mxu1 %vm462_vm15, %v1464_v10 }
  0xbd   : > { %1342 = vmatmul.msk.f32.gmra.mxu2 %vm467_vm1, %v1464_v10  ;;  %1358 = vmatmul.msk.f32.gmra.mxu3 %vm468_vm2, %v1464_v10 }
  0xbf   : > { %1310 = vmatmul.msk.f32.gmra.mxu0 %vm465_vm3, %v1464_v10  ;;  %1326 = vmatmul.msk.f32.gmra.mxu1 %vm466_vm4, %v1464_v10 }
  0xc4   : > { %v694_v26 = vpop.f32.mrf.mxu0  ;;  %v759_v27 = vpop.f32.mrf.mxu1 }
  0xc5   : > { %v760_v28 = vadd.f32 %v759_v27, %v694_v26 }
  0xc8   : > { %v824_v29 = vpop.f32.mrf.mxu2  ;;  %v889_v30 = vpop.f32.mrf.mxu3 }
  0xc9   : > { %v825_v31 = vadd.f32 %v824_v29, %v760_v28 }
  0xcb   : > { %v890_v33 = vadd.f32 %v889_v30, %v825_v31  ;;  %v604_v31 = vld [vmem:[#allocation2 + $0x38] sm:$0xff] }
  0xcc   : > { %v697_v34 = vpop.f32.mrf.mxu0  ;;  %v762_v35 = vpop.f32.mrf.mxu1 }
  0xcd   : > { %v937_v36 = vadd.f32 %v890_v33, %v597_v32  ;;  %v763_v37 = vadd.f32 %v762_v35, %v697_v34 }
  0xcf   : > { %954 = vst.msk [vmem:[#allocation2] sm:$0xff] %vm358_vm0, %v937_v36 }
  0xd0   : > { %v827_v38 = vpop.f32.mrf.mxu2  ;;  %v892_v39 = vpop.f32.mrf.mxu3 }
  0xd1   : > { %v828_v40 = vadd.f32 %v827_v38, %v763_v37 }
  0xd3   : > { %v893_v42 = vadd.f32 %v892_v39, %v828_v40  ;;  %v605_v40 = vld [vmem:[#allocation2 + $0x40] sm:$0xff] }
  0xd4   : > { %v700_v43 = vpop.f32.mrf.mxu0  ;;  %v765_v44 = vpop.f32.mrf.mxu1 }
  0xd5   : > { %v938_v45 = vadd.f32 %v893_v42, %v598_v41  ;;  %v766_v46 = vadd.f32 %v765_v44, %v700_v43 }
  0xd7   : > { %955 = vst.msk [vmem:[#allocation2 + $0x8] sm:$0xff] %vm358_vm0, %v938_v45 }
  0xd8   : > { %v830_v47 = vpop.f32.mrf.mxu2  ;;  %v895_v48 = vpop.f32.mrf.mxu3 }
  0xd9   : > { %v831_v49 = vadd.f32 %v830_v47, %v766_v46 }
  0xdb   : > { %v896_v51 = vadd.f32 %v895_v48, %v831_v49  ;;  %v606_v49 = vld [vmem:[#allocation2 + $0x48] sm:$0xff] }
  0xdc   : > { %v703_v52 = vpop.f32.mrf.mxu0  ;;  %v768_v53 = vpop.f32.mrf.mxu1 }
  0xdd   : > { %v939_v54 = vadd.f32 %v896_v51, %v599_v50  ;;  %v769_v55 = vadd.f32 %v768_v53, %v703_v52 }
  0xdf   : > { %956 = vst.msk [vmem:[#allocation2 + $0x10] sm:$0xff] %vm358_vm0, %v939_v54 }
  0xe0   : > { %v833_v56 = vpop.f32.mrf.mxu2  ;;  %v898_v57 = vpop.f32.mrf.mxu3 }
  0xe1   : > { %v834_v58 = vadd.f32 %v833_v56, %v769_v55 }
  0xe3   : > { %v899_v60 = vadd.f32 %v898_v57, %v834_v58  ;;  %v607_v58 = vld [vmem:[#allocation2 + $0x50] sm:$0xff] }
  0xe4   : > { %v706_v61 = vpop.f32.mrf.mxu0  ;;  %v771_v62 = vpop.f32.mrf.mxu1 }
  0xe5   : > { %v940_v63 = vadd.f32 %v899_v60, %v600_v59  ;;  %v772_v0 = vadd.f32 %v771_v62, %v706_v61 }
  0xe7   : > { %957 = vst.msk [vmem:[#allocation2 + $0x18] sm:$0xff] %vm358_vm0, %v940_v63 }
  0xe8   : > { %v836_v1 = vpop.f32.mrf.mxu2  ;;  %v901_v2 = vpop.f32.mrf.mxu3 }
  0xe9   : > { %v837_v3 = vadd.f32 %v836_v1, %v772_v0 }
  0xeb   : > { %v902_v5 = vadd.f32 %v901_v2, %v837_v3  ;;  %v608_v3 = vld [vmem:[#allocation2 + $0x58] sm:$0xff] }
  0xec   : > { %v709_v6 = vpop.f32.mrf.mxu0  ;;  %v774_v7 = vpop.f32.mrf.mxu1 }
  0xed   : > { %v941_v8 = vadd.f32 %v902_v5, %v601_v4  ;;  %v775_v9 = vadd.f32 %v774_v7, %v709_v6 }
  0xef   : > { %958 = vst.msk [vmem:[#allocation2 + $0x20] sm:$0xff] %vm358_vm0, %v941_v8 }
  0xf0   : > { %v839_v10 = vpop.f32.mrf.mxu2  ;;  %v904_v11 = vpop.f32.mrf.mxu3 }
  0xf1   : > { %v840_v12 = vadd.f32 %v839_v10, %v775_v9 }
  0xf3   : > { %v905_v14 = vadd.f32 %v904_v11, %v840_v12  ;;  %v609_v12 = vld [vmem:[#allocation2 + $0x60] sm:$0xff] }
  0xf4   : > { %v712_v15 = vpop.f32.mrf.mxu0  ;;  %v777_v16 = vpop.f32.mrf.mxu1 }
  0xf5   : > { %v942_v17 = vadd.f32 %v905_v14, %v602_v13  ;;  %v778_v18 = vadd.f32 %v777_v16, %v712_v15 }
  0xf7   : > { %959 = vst.msk [vmem:[#allocation2 + $0x28] sm:$0xff] %vm358_vm0, %v942_v17 }
  0xf8   : > { %v842_v19 = vpop.f32.mrf.mxu2  ;;  %v907_v20 = vpop.f32.mrf.mxu3 }
  0xf9   : > { %v843_v21 = vadd.f32 %v842_v19, %v778_v18 }
  0xfb   : > { %v908_v23 = vadd.f32 %v907_v20, %v843_v21  ;;  %v610_v21 = vld [vmem:[#allocation2 + $0x68] sm:$0xff] }
  0xfc   : > { %v715_v24 = vpop.f32.mrf.mxu0  ;;  %v780_v25 = vpop.f32.mrf.mxu1 }
  0xfd   : > { %v943_v26 = vadd.f32 %v908_v23, %v603_v22  ;;  %v781_v27 = vadd.f32 %v780_v25, %v715_v24 }
  0xff   : > { %960 = vst.msk [vmem:[#allocation2 + $0x30] sm:$0xff] %vm358_vm0, %v943_v26 }
 0x100   : > { %v845_v28 = vpop.f32.mrf.mxu2  ;;  %v910_v29 = vpop.f32.mrf.mxu3 }
 0x101   : > { %v846_v30 = vadd.f32 %v845_v28, %v781_v27 }
 0x103   : > { %v911_v32 = vadd.f32 %v910_v29, %v846_v30  ;;  %v611_v30 = vld [vmem:[#allocation2 + $0x70] sm:$0xff] }
 0x104   : > { %v718_v33 = vpop.f32.mrf.mxu0  ;;  %v783_v34 = vpop.f32.mrf.mxu1 }
 0x105   : > { %v944_v35 = vadd.f32 %v911_v32, %v604_v31  ;;  %v784_v36 = vadd.f32 %v783_v34, %v718_v33 }
 0x107   : > { %961 = vst.msk [vmem:[#allocation2 + $0x38] sm:$0xff] %vm358_vm0, %v944_v35 }
 0x108   : > { %v848_v37 = vpop.f32.mrf.mxu2  ;;  %v913_v38 = vpop.f32.mrf.mxu3 }
 0x109   : > { %v849_v39 = vadd.f32 %v848_v37, %v784_v36 }
 0x10b   : > { %v914_v41 = vadd.f32 %v913_v38, %v849_v39  ;;  %v612_v39 = vld [vmem:[#allocation2 + $0x78] sm:$0xff] }
 0x10c   : > { %v721_v42 = vpop.f32.mrf.mxu0  ;;  %v786_v43 = vpop.f32.mrf.mxu1 }
 0x10d   : > { %v945_v44 = vadd.f32 %v914_v41, %v605_v40  ;;  %v787_v45 = vadd.f32 %v786_v43, %v721_v42 }
 0x10f   : > { %962 = vst.msk [vmem:[#allocation2 + $0x40] sm:$0xff] %vm358_vm0, %v945_v44 }
 0x110   : > { %v851_v46 = vpop.f32.mrf.mxu2  ;;  %v916_v47 = vpop.f32.mrf.mxu3 }
 0x111   : > { %v852_v48 = vadd.f32 %v851_v46, %v787_v45 }
 0x113   : > { %v917_v50 = vadd.f32 %v916_v47, %v852_v48 }
 0x114   : > { %v724_v51 = vpop.f32.mrf.mxu0  ;;  %v789_v52 = vpop.f32.mrf.mxu1 }
 0x115   : > { %v946_v53 = vadd.f32 %v917_v50, %v606_v49  ;;  %v790_v54 = vadd.f32 %v789_v52, %v724_v51 }
 0x117   : > { %963 = vst.msk [vmem:[#allocation2 + $0x48] sm:$0xff] %vm358_vm0, %v946_v53 }
 0x118   : > { %v854_v55 = vpop.f32.mrf.mxu2  ;;  %v919_v56 = vpop.f32.mrf.mxu3 }
 0x119   : > { %v855_v57 = vadd.f32 %v854_v55, %v790_v54 }
 0x11b   : > { %v920_v59 = vadd.f32 %v919_v56, %v855_v57 }
 0x11c   : > { %v727_v60 = vpop.f32.mrf.mxu0  ;;  %v792_v61 = vpop.f32.mrf.mxu1 }
 0x11d   : > { %v947_v62 = vadd.f32 %v920_v59, %v607_v58  ;;  %v793_v63 = vadd.f32 %v792_v61, %v727_v60 }
 0x11f   : > { %964 = vst.msk [vmem:[#allocation2 + $0x50] sm:$0xff] %vm358_vm0, %v947_v62 }
 0x120   : > { %v857_v0 = vpop.f32.mrf.mxu2  ;;  %v922_v1 = vpop.f32.mrf.mxu3 }
 0x121   : > { %v858_v2 = vadd.f32 %v857_v0, %v793_v63 }
 0x123   : > { %v923_v4 = vadd.f32 %v922_v1, %v858_v2 }
 0x124   : > { %v730_v5 = vpop.f32.mrf.mxu0  ;;  %v795_v6 = vpop.f32.mrf.mxu1 }
 0x125   : > { %v948_v7 = vadd.f32 %v923_v4, %v608_v3  ;;  %v796_v8 = vadd.f32 %v795_v6, %v730_v5 }
 0x127   : > { %965 = vst.msk [vmem:[#allocation2 + $0x58] sm:$0xff] %vm358_vm0, %v948_v7 }
 0x128   : > { %v860_v9 = vpop.f32.mrf.mxu2  ;;  %v925_v10 = vpop.f32.mrf.mxu3 }
 0x129   : > { %v861_v11 = vadd.f32 %v860_v9, %v796_v8 }
 0x12b   : > { %v926_v13 = vadd.f32 %v925_v10, %v861_v11 }
 0x12c   : > { %v733_v14 = vpop.f32.mrf.mxu0  ;;  %v798_v15 = vpop.f32.mrf.mxu1 }
 0x12d   : > { %v949_v16 = vadd.f32 %v926_v13, %v609_v12  ;;  %v799_v17 = vadd.f32 %v798_v15, %v733_v14 }
 0x12f   : > { %966 = vst.msk [vmem:[#allocation2 + $0x60] sm:$0xff] %vm358_vm0, %v949_v16 }
 0x130   : > { %v863_v18 = vpop.f32.mrf.mxu2  ;;  %v928_v19 = vpop.f32.mrf.mxu3 }
 0x131   : > { %v864_v20 = vadd.f32 %v863_v18, %v799_v17 }
 0x133   : > { %v929_v22 = vadd.f32 %v928_v19, %v864_v20 }
 0x134   : > { %v736_v23 = vpop.f32.mrf.mxu0  ;;  %v801_v24 = vpop.f32.mrf.mxu1 }
 0x135   : > { %v950_v25 = vadd.f32 %v929_v22, %v610_v21  ;;  %v802_v26 = vadd.f32 %v801_v24, %v736_v23 }
 0x137   : > { %967 = vst.msk [vmem:[#allocation2 + $0x68] sm:$0xff] %vm358_vm0, %v950_v25 }
 0x138   : > { %v866_v27 = vpop.f32.mrf.mxu2  ;;  %v931_v28 = vpop.f32.mrf.mxu3 }
 0x139   : > { %v867_v29 = vadd.f32 %v866_v27, %v802_v26 }
 0x13b   : > { %v932_v31 = vadd.f32 %v931_v28, %v867_v29 }
 0x13c   : > { %v739_v32 = vpop.f32.mrf.mxu0  ;;  %v804_v33 = vpop.f32.mrf.mxu1 }
 0x13d   : > { %v951_v34 = vadd.f32 %v932_v31, %v611_v30  ;;  %v805_v35 = vadd.f32 %v804_v33, %v739_v32 }
 0x13f   : > { %968 = vst.msk [vmem:[#allocation2 + $0x70] sm:$0xff] %vm358_vm0, %v951_v34 }
 0x140   : > { %v869_v36 = vpop.f32.mrf.mxu2  ;;  %v934_v37 = vpop.f32.mrf.mxu3 }
 0x141   : > { %v870_v38 = vadd.f32 %v869_v36, %v805_v35 }
 0x143   : > { %v935_v40 = vadd.f32 %v934_v37, %v870_v38 }
 0x145   : > { %v952_v41 = vadd.f32 %v935_v40, %v612_v39 }
 0x147   : > { %969 = vst.msk [vmem:[#allocation2 + $0x78] sm:$0xff] %vm358_vm0, %v952_v41 }
 0x148 PF: > { %v993_v42 = vld [vmem:[%s1538_s12 + $0x20] sm:$0xff]  ;;  %v991_v43 = vld [vmem:[%s1538_s12 + $0x10] sm:$0xff]  ;;  %v1465_v45 = vmov 0   ;;  %v994_v46 = vld [vmem:[%s1538_s12 + $0x28] sm:$0xff] }
 0x149   : > { %v989_v44 = vld [vmem:[%s1538_s12] sm:$0xff]  ;;  %1410 = vset.pattern.permute.xlu2 %v1465_v45  ;;  %1409 = vset.pattern.permute.xlu1 %v1465_v45  ;;  %v992_v47 = vld [vmem:[%s1538_s12 + $0x18] sm:$0xff]  ;;  %v990_v48 = vld [vmem:[%s1538_s12 + $0x8] sm:$0xff] }
 0x14a   : > { %1408 = vset.pattern.permute.xlu0 %v1465_v45  ;;  %1027 = vperm.xlu2 %1410, %v993_v42   ;;  %v997_v49 = vld [vmem:[%s1538_s12 + $0x40] sm:$0xff]  ;;  %v996_v50 = vld [vmem:[%s1538_s12 + $0x38] sm:$0xff]  ;;  %v995_v51 = vld [vmem:[%s1538_s12 + $0x30] sm:$0xff] }
 0x14b   : > { %1017 = vperm.xlu1 %1409, %v991_v43   ;;  %1007 = vperm.xlu0 %1408, %v989_v44   ;;  %v1000_v52 = vld [vmem:[%s1538_s12 + $0x58] sm:$0xff]  ;;  %v999_v53 = vld [vmem:[%s1538_s12 + $0x50] sm:$0xff]  ;;  %v998_v54 = vld [vmem:[%s1538_s12 + $0x48] sm:$0xff] }
 0x14c   : > { %v1003_v55 = vld [vmem:[%s1538_s12 + $0x70] sm:$0xff]  ;;  %v1002_v56 = vld [vmem:[%s1538_s12 + $0x68] sm:$0xff]  ;;  %v1001_v57 = vld [vmem:[%s1538_s12 + $0x60] sm:$0xff] }
 0x14d   : > { %v1004_v58 = vld [vmem:[%s1538_s12 + $0x78] sm:$0xff]  ;;  %v977_v59 = vld [vmem:[#allocation2 + $0x20] sm:$0xff]  ;;  %v978_v62 = vld [vmem:[#allocation2 + $0x28] sm:$0xff] }
 0x14e   : > { %v981_v1 = vld [vmem:[#allocation2 + $0x40] sm:$0xff]  ;;  %v984_v4 = vld [vmem:[#allocation2 + $0x58] sm:$0xff]  ;;  %v975_v5 = vld [vmem:[#allocation2 + $0x10] sm:$0xff] }
 0x14f   : > { %v973_v6 = vld [vmem:[#allocation2] sm:$0xff]  ;;  %v987_v13 = vld [vmem:[#allocation2 + $0x70] sm:$0xff]  ;;  %v976_v14 = vld [vmem:[#allocation2 + $0x18] sm:$0xff] }
 0x150   : > { %v974_v15 = vld [vmem:[#allocation2 + $0x8] sm:$0xff]  ;;  %v980_v22 = vld [vmem:[#allocation2 + $0x38] sm:$0xff]  ;;  %v979_v23 = vld [vmem:[#allocation2 + $0x30] sm:$0xff] }
 0x151   : > { %v983_v28 = vld [vmem:[#allocation2 + $0x50] sm:$0xff]  ;;  %v982_v29 = vld [vmem:[#allocation2 + $0x48] sm:$0xff]  ;;  %v985_v35 = vld [vmem:[#allocation2 + $0x60] sm:$0xff] }
 0x152   : > { %1032 = vperm.xlu2 %1410, %v994_v46   ;;  %v986_v34 = vld [vmem:[#allocation2 + $0x68] sm:$0xff]  ;;  %v988_v40 = vld [vmem:[#allocation2 + $0x78] sm:$0xff] }
 0x153   : > { %1022 = vperm.xlu1 %1409, %v992_v47   ;;  %1012 = vperm.xlu0 %1408, %v990_v48  }
 0x15a   : > { %1047 = vperm.xlu2 %1410, %v997_v49  }
 0x15b   : > { %1042 = vperm.xlu1 %1409, %v996_v50   ;;  %1037 = vperm.xlu0 %1408, %v995_v51  }
 0x162   : > { %1062 = vperm.xlu2 %1410, %v1000_v52  }
 0x163   : > { %1057 = vperm.xlu1 %1409, %v999_v53   ;;  %1052 = vperm.xlu0 %1408, %v998_v54  }
 0x16a   : > { %1077 = vperm.xlu2 %1410, %v1003_v55  }
 0x16b   : > { %1072 = vperm.xlu1 %1409, %v1002_v56   ;;  %1067 = vperm.xlu0 %1408, %v1001_v57  }
 0x173   : > { %1082 = vperm.xlu0 %1408, %v1004_v58  }
 0x1a4   : > { %v1028_v60 = vpop.permute.xlu2 %1027 }
 0x1a5   : > { %v1089_v61 = vmul.f32 %v1028_v60, %v977_v59 }
 0x1a7   : > { %1106 = vst.msk [vmem:[%s1548_s16 + $0x20] sm:$0xff] %vm358_vm0, %v1089_v61 }
 0x1ac   : > { %v1033_v63 = vpop.permute.xlu2 %1032 }
 0x1ad   : > { %v1090_v0 = vmul.f32 %v1033_v63, %v978_v62 }
 0x1af   : > { %1107 = vst.msk [vmem:[%s1548_s16 + $0x28] sm:$0xff] %vm358_vm0, %v1090_v0 }
 0x1b4   : > { %v1048_v2 = vpop.permute.xlu2 %1047 }
 0x1b5   : > { %v1093_v3 = vmul.f32 %v1048_v2, %v981_v1 }
 0x1b7   : > { %1110 = vst.msk [vmem:[%s1548_s16 + $0x40] sm:$0xff] %vm358_vm0, %v1093_v3 }
 0x1bc   : > { %v1063_v7 = vpop.permute.xlu2 %1062 }
 0x1bd   : > { %v1096_v8 = vmul.f32 %v1063_v7, %v984_v4  ;;  %v1018_v9 = vpop.permute.xlu1 %1017  ;;  %v1008_v10 = vpop.permute.xlu0 %1007 }
 0x1be   : > { %v1087_v11 = vmul.f32 %v1018_v9, %v975_v5  ;;  %v1085_v12 = vmul.f32 %v1008_v10, %v973_v6 }
 0x1bf   : > { %1113 = vst.msk [vmem:[%s1548_s16 + $0x58] sm:$0xff] %vm358_vm0, %v1096_v8 }
 0x1c0   : > { %1104 = vst.msk [vmem:[%s1548_s16 + $0x10] sm:$0xff] %vm358_vm0, %v1087_v11 }
 0x1c1   : > { %1102 = vst.msk [vmem:[%s1548_s16] sm:$0xff] %vm358_vm0, %v1085_v12 }
 0x1c4   : > { %v1078_v16 = vpop.permute.xlu2 %1077 }
 0x1c5   : > { %v1099_v17 = vmul.f32 %v1078_v16, %v987_v13  ;;  %v1023_v18 = vpop.permute.xlu1 %1022  ;;  %v1013_v19 = vpop.permute.xlu0 %1012 }
 0x1c6   : > { %v1088_v20 = vmul.f32 %v1023_v18, %v976_v14  ;;  %v1086_v21 = vmul.f32 %v1013_v19, %v974_v15 }
 0x1c7   : > { %1116 = vst.msk [vmem:[%s1548_s16 + $0x70] sm:$0xff] %vm358_vm0, %v1099_v17 }
 0x1c8   : > { %1105 = vst.msk [vmem:[%s1548_s16 + $0x18] sm:$0xff] %vm358_vm0, %v1088_v20 }
 0x1c9   : > { %1103 = vst.msk [vmem:[%s1548_s16 + $0x8] sm:$0xff] %vm358_vm0, %v1086_v21 }
 0x1cd   : > { %v1043_v24 = vpop.permute.xlu1 %1042  ;;  %v1038_v25 = vpop.permute.xlu0 %1037 }
 0x1ce   : > { %v1092_v26 = vmul.f32 %v1043_v24, %v980_v22  ;;  %v1091_v27 = vmul.f32 %v1038_v25, %v979_v23 }
 0x1d0   : > { %1109 = vst.msk [vmem:[%s1548_s16 + $0x38] sm:$0xff] %vm358_vm0, %v1092_v26 }
 0x1d1   : > { %1108 = vst.msk [vmem:[%s1548_s16 + $0x30] sm:$0xff] %vm358_vm0, %v1091_v27 }
 0x1d5   : > { %v1058_v30 = vpop.permute.xlu1 %1057  ;;  %v1053_v31 = vpop.permute.xlu0 %1052 }
 0x1d6   : > { %v1095_v32 = vmul.f32 %v1058_v30, %v983_v28  ;;  %v1094_v33 = vmul.f32 %v1053_v31, %v982_v29 }
 0x1d8   : > { %1112 = vst.msk [vmem:[%s1548_s16 + $0x50] sm:$0xff] %vm358_vm0, %v1095_v32 }
 0x1d9   : > { %1111 = vst.msk [vmem:[%s1548_s16 + $0x48] sm:$0xff] %vm358_vm0, %v1094_v33 }
 0x1dd   : > { %v1073_v36 = vpop.permute.xlu1 %1072  ;;  %v1068_v37 = vpop.permute.xlu0 %1067 }
 0x1de   : > { %v1098_v38 = vmul.f32 %v1073_v36, %v986_v34  ;;  %v1097_v39 = vmul.f32 %v1068_v37, %v985_v35 }
 0x1e0   : > { %1115 = vst.msk [vmem:[%s1548_s16 + $0x68] sm:$0xff] %vm358_vm0, %v1098_v38 }
 0x1e1   : > { %1114 = vst.msk [vmem:[%s1548_s16 + $0x60] sm:$0xff] %vm358_vm0, %v1097_v39 }
 0x1e5   : > { %v1083_v41 = vpop.permute.xlu0 %1082 }
 0x1e6   : > { %v1100_v42 = vmul.f32 %v1083_v41, %v988_v40 }
 0x1e8   : > { %1117 = vst.msk [vmem:[%s1548_s16 + $0x78] sm:$0xff] %vm358_vm0, %v1100_v42 }
 0x1e9 PF: > { %s28_s28 = sadd.s32 1, %s1459_s28   ;;  %s1892_s26 = smov %s1455_s27 }
 0x1ea   : > { %p25_p10 = scmp.ge.s32.totalorder %s28_s28, 4   ;;  %s1893_s27 = smov %s1895_s0 }
 0x1ec   :  { %27 = sbr.rel (!%p25_p10) target bundleno = 9 (0x9), region = 80 }

</bundles_post_ra>
